<compile_context>
chip_gen: v7x
topology: tpu7x:2x2x1
jax: 0.10.0
libtpu: 0.0.40
codegen_flags: <defaults>
</compile_context>

<pallas_src>
import functools
import math

import jax
import jax.numpy as jnp
from jax import lax
from jax.experimental import pallas as pl
from jax.experimental.pallas import tpu as pltpu

_INV_SQRT2 = 1.0 / math.sqrt(2.0)
_SQRT_2_OVER_PI = math.sqrt(2.0 / math.pi)


def _round_up(v, m):
    return ((v + m - 1) // m) * m


def _cdiv(a, b):
    return -(-a // b)


def _gelu(h, approx):
    if approx:
        # tanh approximation (lands on the EUP slot); NOT the nn.GELU() default.
        return 0.5 * h * (1.0 + jnp.tanh(_SQRT_2_OVER_PI * (h + 0.044715 * (h * h * h))))
    # exact erf GELU: 0.5 * x * (1 + erf(x / sqrt(2))), matches torch.nn.GELU()
    return 0.5 * h * (1.0 + lax.erf(h * _INV_SQRT2))


def _mlp_kernel_fused(x_ref, w1_ref, w2_ref, o_ref, *, act_dtype, approx):
    # Single H chunk: weights fully resident, no accumulator scratch needed.
    x = x_ref[...]                                                   # native dtype
    h = jnp.dot(x, w1_ref[...], preferred_element_type=jnp.float32)  # fc1 (MXU, f32 acc)
    h = _gelu(h.astype(act_dtype), approx)                           # GELU in fc2-LHS dtype
    # dropout(p=0.0) after act and after fc2 are identities -> no-ops.
    y = jnp.dot(h.astype(w2_ref.dtype), w2_ref[...],
                preferred_element_type=jnp.float32)                  # fc2
    o_ref[...] = y.astype(o_ref.dtype)


def _mlp_kernel_chunked(x_ref, w1_ref, w2_ref, o_ref, acc_ref, *, act_dtype, approx):
    # H streamed in chunks: acc_ref (f32 VMEM) accumulates fc2 partial products.
    hi = pl.program_id(1)

    @pl.when(hi == 0)
    def _():
        acc_ref[...] = jnp.zeros_like(acc_ref)

    x = x_ref[...]
    h = jnp.dot(x, w1_ref[...], preferred_element_type=jnp.float32)
    h = _gelu(h.astype(act_dtype), approx)
    acc_ref[...] += jnp.dot(h.astype(w2_ref.dtype), w2_ref[...],
                            preferred_element_type=jnp.float32)

    @pl.when(hi == pl.num_programs(1) - 1)
    def _():
        o_ref[...] = acc_ref[...].astype(o_ref.dtype)


def mlp_pallas(x, w1, w2, *, tm=None, h_chunk=None, approx_gelu=False):
    """x: (B, N, D_in); w1: (D_in, H); w2: (H, D_out). Returns (B, N, D_out)."""
    B, N, D_in = x.shape
    D_in_w, H = w1.shape
    H_w, D_out = w2.shape
    assert D_in_w == D_in and H_w == H
    M = B * N
    x2d = x.reshape(M, D_in)
    out_dtype = x.dtype

    x_sz = jnp.dtype(x.dtype).itemsize
    w1_sz = jnp.dtype(w1.dtype).itemsize
    w2_sz = jnp.dtype(w2.dtype).itemsize

    # GELU / fc2-LHS dtype: narrow to the weight dtype (halves VALU work + vreg
    # pressure for bf16 on v6e/v7x); stays f32 for f32 weights.
    act_dtype = jnp.dtype(w2.dtype)
    act_sz = act_dtype.itemsize

    # ---- VMEM capacity per TensorCore (v7x: 64 MiB; v5e/v6e: 128 MiB) ----------
    try:
        vmem_cap = int(pltpu.get_tpu_info().vmem_capacity_bytes)
    except Exception:
        vmem_cap = 64 * 1024 * 1024          # conservative default (v7x per-TC)
    vmem_target = int(0.75 * vmem_cap)       # leave headroom for compiler temps

    # ---- Lane padding only when needed (exact: zero rows/cols contribute 0) ----
    D_in_p = _round_up(D_in, 128)
    H_p = _round_up(H, 128)
    D_out_p = _round_up(D_out, 128)
    # TODO(synk): on v6e/v7x, pad odd-multiple-of-128 output dims (e.g. 384) to 256
    # so every 256-wide MXU pass runs full width.

    # ---- H chunking: stream W1/W2 in slabs only when they don't fit resident ----
    w_resident = D_in_p * H_p * w1_sz + H_p * D_out_p * w2_sz   # single-buffered
    if h_chunk is None:
        h_chunk = H_p if w_resident <= int(0.8 * vmem_target) else 512
    h_chunk = min(_round_up(h_chunk, 128), H_p)
    H_p = _round_up(H_p, h_chunk)
    nh = H_p // h_chunk

    # ---- Row tile: big tiles amortize per-step overhead; shrink to fit VMEM ----
    sub = {4: 8, 2: 16, 1: 32}.get(x_sz, 8)   # sublane granularity per dtype

    def est_vmem(tm_):
        wbuf = (D_in_p * h_chunk * w1_sz + h_chunk * D_out_p * w2_sz) * (1 if nh == 1 else 2)
        xbuf = 2 * tm_ * D_in_p * x_sz                 # double-buffered input tile
        obuf = 2 * tm_ * D_out_p * x_sz                # double-buffered output tile
        accb = tm_ * D_out_p * 4 if nh > 1 else 0      # f32 accumulator scratch
        inter = tm_ * h_chunk * (4 + act_sz)           # fc1 f32 result + GELU temp
        return wbuf + xbuf + obuf + accb + inter

    if tm is None:
        tm = 1024 if (x_sz <= 2 and vmem_cap > (64 << 20)) else 512
    tm_ = max(sub, min(_round_up(tm, sub), _round_up(M, sub)))
    while tm_ > sub and est_vmem(tm_) > vmem_target:
        tm_ = max(sub, _round_up(tm_ // 2, sub))

    grid_m = _cdiv(M, tm_)
    # Even tile count -> balanced split across v7x's two TensorCores (skip if it
    # would create a fully-empty last tile).
    if grid_m > 1 and grid_m % 2 == 1:
        tm_even = max(sub, _round_up(_cdiv(M, grid_m + 1), sub))
        if _cdiv(M, tm_even) == grid_m + 1:
            tm_, grid_m = tm_even, grid_m + 1

    # ---- Pad only what is strictly needed (no-op for 128-aligned ViT dims). ----
    # M is NOT padded: the last tile is ragged and OOB rows are dropped on writeback.
    # TODO(synk): in a real model, pad the weights once at parameter load, not per call.
    x_in = x2d if D_in_p == D_in else jnp.pad(x2d, ((0, 0), (0, D_in_p - D_in)))
    w1_in = w1 if (D_in_p == D_in and H_p == H) else jnp.pad(
        w1, ((0, D_in_p - D_in), (0, H_p - H)))
    w2_in = w2 if (H_p == H and D_out_p == D_out) else jnp.pad(
        w2, ((0, H_p - H), (0, D_out_p - D_out)))

    grid = (grid_m, nh)
    kernel = functools.partial(
        _mlp_kernel_chunked if nh > 1 else _mlp_kernel_fused,
        act_dtype=act_dtype, approx=approx_gelu)

    est = est_vmem(tm_)
    vmem_limit = int(min(max(int(est * 1.4) + (4 << 20), 32 << 20), int(0.9 * vmem_cap)))

    cost = pl.CostEstimate(
        flops=2 * grid_m * tm_ * (D_in_p * H_p + H_p * D_out_p),
        transcendentals=grid_m * tm_ * H_p,
        bytes_accessed=(x_in.size * x_sz
                        + w1_in.size * w1_sz * (1 if nh == 1 else grid_m)
                        + w2_in.size * w2_sz * (1 if nh == 1 else grid_m)
                        + M * D_out_p * jnp.dtype(out_dtype).itemsize),
    )

    def build(single_buffer_weights):
        # Constant-index resident weights need only one pipeline buffer.
        wmode = pl.Buffered(1) if (single_buffer_weights and nh == 1) else None

        def wspec(shape, index_map):
            if wmode is None:
                return pl.BlockSpec(shape, index_map)
            return pl.BlockSpec(shape, index_map, pipeline_mode=wmode)

        return pl.pallas_call(
            kernel,
            out_shape=jax.ShapeDtypeStruct((M, D_out_p), out_dtype),
            grid_spec=pltpu.PrefetchScalarGridSpec(
                num_scalar_prefetch=0,
                grid=grid,
                in_specs=[
                    pl.BlockSpec((tm_, D_in_p), lambda i, h: (i, 0)),    # streamed x tile
                    wspec((D_in_p, h_chunk), lambda i, h: (0, h)),       # W1 (chunk)
                    wspec((h_chunk, D_out_p), lambda i, h: (h, 0)),      # W2 (chunk)
                ],
                out_specs=pl.BlockSpec((tm_, D_out_p), lambda i, h: (i, 0)),
                scratch_shapes=(
                    [pltpu.VMEM((tm_, D_out_p), jnp.float32)] if nh > 1 else []),
            ),
            compiler_params=pltpu.CompilerParams(
                dimension_semantics=("parallel", "arbitrary"),
                vmem_limit_bytes=vmem_limit,
            ),
            cost_estimate=cost,
        )

    try:
        out2d = build(single_buffer_weights=True)(x_in, w1_in, w2_in)
    except Exception:
        # Fallback for Pallas versions without per-BlockSpec pipeline_mode support.
        out2d = build(single_buffer_weights=False)(x_in, w1_in, w2_in)

    if D_out_p != D_out:
        out2d = out2d[:, :D_out]
    return out2d.reshape(B, N, D_out)


def mlp_reference(x, w1, w2):
    h = jnp.einsum("bnd,dh->bnh", x.astype(jnp.float32), w1.astype(jnp.float32))
    h = 0.5 * h * (1.0 + lax.erf(h * _INV_SQRT2))
    y = jnp.einsum("bnh,ho->bno", h, w2.astype(jnp.float32))
    return y.astype(x.dtype)


if __name__ == "__main__":
    # Small shapes consistent with the module: tokens (B, N, D_in), hidden H.
    B, N = 2, 8
    in_features = 32
    hidden_features = 64
    out_features = in_features  # out_features defaults to in_features

    key = jax.random.PRNGKey(0)
    kx, k1, k2 = jax.random.split(key, 3)

    x = jax.random.normal(kx, (B, N, in_features), dtype=jnp.float32)

    # Deterministic "Kaiming-uniform-like" init, stored as (in, out) so y = x @ W.
    bound1 = 1.0 / math.sqrt(in_features)
    bound2 = 1.0 / math.sqrt(hidden_features)
    w1 = jax.random.uniform(k1, (in_features, hidden_features),
                            minval=-bound1, maxval=bound1, dtype=jnp.float32)
    w2 = jax.random.uniform(k2, (hidden_features, out_features),
                            minval=-bound2, maxval=bound2, dtype=jnp.float32)

    out = jax.block_until_ready(mlp_pallas(x, w1, w2))
    ref = mlp_reference(x, w1, w2)
    assert out.shape == (B, N, out_features)
    assert jnp.allclose(out, ref, atol=1e-4, rtol=1e-4), "mismatch vs reference (fused path)"

    # Also exercise the H-chunked reduction path (scratch accumulator + pl.when).
    H2 = 256
    bound2b = 1.0 / math.sqrt(H2)
    w1b = jax.random.uniform(k1, (in_features, H2),
                             minval=-bound1, maxval=bound1, dtype=jnp.float32)
    w2b = jax.random.uniform(k2, (H2, out_features),
                             minval=-bound2b, maxval=bound2b, dtype=jnp.float32)
    out2 = jax.block_until_ready(mlp_pallas(x, w1b, w2b, h_chunk=128))
    ref2 = mlp_reference(x, w1b, w2b)
    assert jnp.allclose(out2, ref2, atol=1e-4, rtol=1e-4), "mismatch vs reference (chunked path)"

    print("KERNEL_OK")
</pallas_src>

<mosaic_0001>
module attributes {stable_mosaic.version = 11 : i64} {
  func.func @_mlp_kernel_fused(%arg0: i32, %arg1: i32, %arg2: memref<16x128xf32, #tpu.memory_space<vmem>>, %arg3: memref<128x128xf32, #tpu.memory_space<vmem>>, %arg4: memref<128x128xf32, #tpu.memory_space<vmem>>, %arg5: memref<16x128xf32, #tpu.memory_space<vmem>>) attributes {dimension_semantics = [#tpu.dimension_semantics<parallel>, #tpu.dimension_semantics<arbitrary>], iteration_bounds = array<i64: 1, 1>, scalar_prefetch = 0 : i64, scratch_operands = 0 : i64, tpu.core_type = #tpu.core_type<tc>, window_params = [{transform_indices = @transform_0, window_bounds = array<i64: 16, 128>}, {pipeline_mode = #tpu.pipeline_mode<synchronous>, transform_indices = @transform_1, window_bounds = array<i64: 128, 128>}, {pipeline_mode = #tpu.pipeline_mode<synchronous>, transform_indices = @transform_2, window_bounds = array<i64: 128, 128>}, {transform_indices = @transform_3, window_bounds = array<i64: 16, 128>}]} {
    %c0 = arith.constant 0 : index
    %c0_0 = arith.constant 0 : index
    %0 = vector.load %arg2[%c0, %c0_0] : memref<16x128xf32, #tpu.memory_space<vmem>>, vector<16x128xf32>
    %c0_1 = arith.constant 0 : index
    %c0_2 = arith.constant 0 : index
    %1 = vector.load %arg3[%c0_1, %c0_2] : memref<128x128xf32, #tpu.memory_space<vmem>>, vector<128x128xf32>
    %cst = arith.constant dense<0.000000e+00> : vector<16x128xf32>
    %2 = tpu.matmul %0, %1, %cst {dimension_numbers = #tpu.dot_dimension_numbers<[1], [0], [0], [1], [0, 0, 1, 1], [], []>} : vector<16x128xf32>, vector<128x128xf32>, vector<16x128xf32> -> vector<16x128xf32>
    %cst_3 = arith.constant 5.000000e-01 : f32
    %3 = vector.broadcast %cst_3 : f32 to vector<16x128xf32>
    %4 = arith.mulf %3, %2 : vector<16x128xf32>
    %cst_4 = arith.constant 0.707106769 : f32
    %5 = vector.broadcast %cst_4 : f32 to vector<16x128xf32>
    %6 = arith.mulf %2, %5 : vector<16x128xf32>
    %7 = math.erf %6 : vector<16x128xf32>
    %cst_5 = arith.constant 1.000000e+00 : f32
    %8 = vector.broadcast %cst_5 : f32 to vector<16x128xf32>
    %9 = arith.addf %8, %7 : vector<16x128xf32>
    %10 = arith.mulf %4, %9 : vector<16x128xf32>
    %c0_6 = arith.constant 0 : index
    %c0_7 = arith.constant 0 : index
    %11 = vector.load %arg4[%c0_6, %c0_7] : memref<128x128xf32, #tpu.memory_space<vmem>>, vector<128x128xf32>
    %cst_8 = arith.constant dense<0.000000e+00> : vector<16x128xf32>
    %12 = tpu.matmul %10, %11, %cst_8 {dimension_numbers = #tpu.dot_dimension_numbers<[1], [0], [0], [1], [0, 0, 1, 1], [], []>} : vector<16x128xf32>, vector<128x128xf32>, vector<16x128xf32> -> vector<16x128xf32>
    %c0_9 = arith.constant 0 : index
    %c0_10 = arith.constant 0 : index
    %13 = vector.load %arg5[%c0_9, %c0_10] : memref<16x128xf32, #tpu.memory_space<vmem>>, vector<16x128xf32>
    tpu.vector_store %arg5[%c0_9, %c0_10], %12 {strides = array<i32>} : memref<16x128xf32, #tpu.memory_space<vmem>>, vector<16x128xf32>,
    return
  }
  func.func @transform_0(%arg0: i32, %arg1: i32) -> (i32, i32) {
    %c0_i32 = arith.constant 0 : i32
    %c0_i32_0 = arith.constant 0 : i32
    return %arg0, %c0_i32 : i32, i32
  }
  func.func @transform_1(%arg0: i32, %arg1: i32) -> (i32, i32) {
    %c0_i32 = arith.constant 0 : i32
    %c0_i32_0 = arith.constant 0 : i32
    return %c0_i32, %arg1 : i32, i32
  }
  func.func @transform_2(%arg0: i32, %arg1: i32) -> (i32, i32) {
    %c0_i32 = arith.constant 0 : i32
    %c0_i32_0 = arith.constant 0 : i32
    return %arg1, %c0_i32 : i32, i32
  }
  func.func @transform_3(%arg0: i32, %arg1: i32) -> (i32, i32) {
    %c0_i32 = arith.constant 0 : i32
    %c0_i32_0 = arith.constant 0 : i32
    return %arg0, %c0_i32 : i32, i32
  }
}

module attributes {stable_mosaic.version = 11 : i64} {
  func.func @_mlp_kernel_fused(%arg0: i32, %arg1: i32, %arg2: memref<16x128xf32, #tpu.memory_space<vmem>>, %arg3: memref<128x128xf32, #tpu.memory_space<vmem>>, %arg4: memref<128x128xf32, #tpu.memory_space<vmem>>, %arg5: memref<16x128xf32, #tpu.memory_space<vmem>>) attributes {dimension_semantics = [#tpu.dimension_semantics<parallel>, #tpu.dimension_semantics<arbitrary>], iteration_bounds = array<i64: 1, 1>, scalar_prefetch = 0 : i64, scratch_operands = 0 : i64, tpu.core_type = #tpu.core_type<tc>, window_params = [{transform_indices = @transform_0, window_bounds = array<i64: 16, 128>}, {transform_indices = @transform_1, window_bounds = array<i64: 128, 128>}, {transform_indices = @transform_2, window_bounds = array<i64: 128, 128>}, {transform_indices = @transform_3, window_bounds = array<i64: 16, 128>}]} {
    %c0 = arith.constant 0 : index
    %c0_0 = arith.constant 0 : index
    %0 = vector.load %arg2[%c0, %c0_0] : memref<16x128xf32, #tpu.memory_space<vmem>>, vector<16x128xf32>
    %c0_1 = arith.constant 0 : index
    %c0_2 = arith.constant 0 : index
    %1 = vector.load %arg3[%c0_1, %c0_2] : memref<128x128xf32, #tpu.memory_space<vmem>>, vector<128x128xf32>
    %cst = arith.constant dense<0.000000e+00> : vector<16x128xf32>
    %2 = tpu.matmul %0, %1, %cst {dimension_numbers = #tpu.dot_dimension_numbers<[1], [0], [0], [1], [0, 0, 1, 1], [], []>} : vector<16x128xf32>, vector<128x128xf32>, vector<16x128xf32> -> vector<16x128xf32>
    %cst_3 = arith.constant 5.000000e-01 : f32
    %3 = vector.broadcast %cst_3 : f32 to vector<16x128xf32>
    %4 = arith.mulf %3, %2 : vector<16x128xf32>
    %cst_4 = arith.constant 0.707106769 : f32
    %5 = vector.broadcast %cst_4 : f32 to vector<16x128xf32>
    %6 = arith.mulf %2, %5 : vector<16x128xf32>
    %7 = math.erf %6 : vector<16x128xf32>
    %cst_5 = arith.constant 1.000000e+00 : f32
    %8 = vector.broadcast %cst_5 : f32 to vector<16x128xf32>
    %9 = arith.addf %8, %7 : vector<16x128xf32>
    %10 = arith.mulf %4, %9 : vector<16x128xf32>
    %c0_6 = arith.constant 0 : index
    %c0_7 = arith.constant 0 : index
    %11 = vector.load %arg4[%c0_6, %c0_7] : memref<128x128xf32, #tpu.memory_space<vmem>>, vector<128x128xf32>
    %cst_8 = arith.constant dense<0.000000e+00> : vector<16x128xf32>
    %12 = tpu.matmul %10, %11, %cst_8 {dimension_numbers = #tpu.dot_dimension_numbers<[1], [0], [0], [1], [0, 0, 1, 1], [], []>} : vector<16x128xf32>, vector<128x128xf32>, vector<16x128xf32> -> vector<16x128xf32>
    %c0_9 = arith.constant 0 : index
    %c0_10 = arith.constant 0 : index
    %13 = vector.load %arg5[%c0_9, %c0_10] : memref<16x128xf32, #tpu.memory_space<vmem>>, vector<16x128xf32>
    tpu.vector_store %arg5[%c0_9, %c0_10], %12 {strides = array<i32>} : memref<16x128xf32, #tpu.memory_space<vmem>>, vector<16x128xf32>,
    return
  }
  func.func @transform_0(%arg0: i32, %arg1: i32) -> (i32, i32) {
    %c0_i32 = arith.constant 0 : i32
    %c0_i32_0 = arith.constant 0 : i32
    return %arg0, %c0_i32 : i32, i32
  }
  func.func @transform_1(%arg0: i32, %arg1: i32) -> (i32, i32) {
    %c0_i32 = arith.constant 0 : i32
    %c0_i32_0 = arith.constant 0 : i32
    return %c0_i32, %arg1 : i32, i32
  }
  func.func @transform_2(%arg0: i32, %arg1: i32) -> (i32, i32) {
    %c0_i32 = arith.constant 0 : i32
    %c0_i32_0 = arith.constant 0 : i32
    return %arg1, %c0_i32 : i32, i32
  }
  func.func @transform_3(%arg0: i32, %arg1: i32) -> (i32, i32) {
    %c0_i32 = arith.constant 0 : i32
    %c0_i32_0 = arith.constant 0 : i32
    return %arg0, %c0_i32 : i32, i32
  }
}

</mosaic_0001>

<bundles_post_ra>
// kernel: tpu_custom_call.1
= control target key start
LH: loop header
LB: loop body
LE: loop exit
PB: predicated region body
PF: predicated region fallthrough
CT: control target
= control target key end

     0   :  { %8 = vsyncpa [#allocation3], 0  ;;  %s637_s0 = inlined_call_operand.hbm [shape: f32[16,128], index: 0, kind: input, shape index: {}]   ;;  %s638_s1 = inlined_call_operand.hbm [shape: f32[128,128], index: 1, kind: input, shape index: {}]   ;;  %s639_s2 = inlined_call_operand.hbm [shape: f32[128,128], index: 2, kind: input, shape index: {}]   ;;  %s640_s3 = inlined_call_operand.hbm [shape: f32[16,128], index: 3, kind: output, shape index: {}]  }
   0x1   :  { %9 = vsyncpa [#allocation6], 0 }
   0x2   :  { %10 = vsyncpa [#allocation4], 0  ;;  %s544_s12 = smov [#allocation5]   ;;  %s545_s14 = smov [#allocation2]  }
   0x3   :  { %s28_s13 = sshll.u32 %s544_s12, 4  ;;  %s16_s15 = sshll.u32 %s545_s14, 4  ;;  %s29_s13 = int_to_ptr.vmem [resolvable:$true] %s28_s13  ;;  %s570_s15 = int_to_ptr.vmem [resolvable:$true] %s16_s15 }
   0x4   :  { %s450_s18 = scalar_lea.hbm %s638_s1, 2048 }
   0x5   :  { %p451_p0 = scmp.ne.s32.totalorder %s638_s1, %s450_s18  ;;  %p454_p1 = scmp.lt.u32.totalorder %s450_s18, %s638_s1 }
   0x7   :  { %p456_p2 = pnand %p454_p1, %p451_p0 }
   0x9   :  { %459 = shalt.err (!%p456_p2)
}
   0xa   :  { %s460_s23 = scalar_lea.vmem %s29_s13, 2048  ;;  %p465_p4 = scmp.lt.s32.totalorder %s29_s13, %s29_s13 }
   0xb   :  { %p461_p3 = scmp.ne.s32.totalorder %s29_s13, %s460_s23  ;;  %p466_p5 = scmp.lt.s32.totalorder %s460_s23, %s460_s23 }
   0xd   :  { %p467_p6 = por %p466_p5, %p465_p4 }
   0xf   :  { %p468_p7 = pnand %p467_p6, %p461_p3 }
  0x11   :  { %471 = shalt.err (!%p468_p7)
}
  0x12   :  { %s546_s24 = smov 128   ;;  %s547_s25 = smov 8  }
  0x13   :  { %34 = dma.hbm_to_vmem [thread:$0]  %s638_s1, 2048, %s29_s13, [#allocation6], %s546_s24, %s546_s24, %s547_s25  }
  0x14   :  { %s472_s30 = scalar_lea.hbm %s637_s0, 256 }
  0x15   :  { %p473_p8 = scmp.ne.s32.totalorder %s637_s0, %s472_s30  ;;  %p476_p9 = scmp.lt.u32.totalorder %s472_s30, %s637_s0 }
  0x17   :  { %p478_p10 = pnand %p476_p9, %p473_p8 }
  0x19   :  { %481 = shalt.err (!%p478_p10)
}
  0x1a   :  { %s482_s8 = scalar_lea.vmem %s570_s15, 256  ;;  %p487_p12 = scmp.lt.s32.totalorder %s570_s15, %s570_s15 }
  0x1b   :  { %p483_p11 = scmp.ne.s32.totalorder %s570_s15, %s482_s8  ;;  %p488_p13 = scmp.lt.s32.totalorder %s482_s8, %s482_s8 }
  0x1d   :  { %p489_p0 = por %p488_p13, %p487_p12 }
  0x1f   :  { %p490_p1 = pnand %p489_p0, %p483_p11 }
  0x21   :  { %493 = shalt.err (!%p490_p1)
}
  0x22   :  { %22 = dma.hbm_to_vmem [thread:$0]  %s637_s0, 256, %s570_s15, [#allocation3], %s546_s24, %s546_s24, %s547_s25  }
  0x23   :  { %s548_s10 = smov [#allocation7]   ;;  %s494_s14 = scalar_lea.hbm %s639_s2, 2048 }
  0x24   :  { %s40_s11 = sshll.u32 %s548_s10, 4  ;;  %p495_p2 = scmp.ne.s32.totalorder %s639_s2, %s494_s14  ;;  %s41_s11 = int_to_ptr.vmem [resolvable:$true] %s40_s11 }
  0x25   :  { %p498_p3 = scmp.lt.u32.totalorder %s494_s14, %s639_s2 }
  0x27   :  { %p500_p4 = pnand %p498_p3, %p495_p2 }
  0x29   :  { %503 = shalt.err (!%p500_p4)
}
  0x2a   :  { %s504_s20 = scalar_lea.vmem %s41_s11, 2048  ;;  %p509_p6 = scmp.lt.s32.totalorder %s41_s11, %s41_s11 }
  0x2b   :  { %p505_p5 = scmp.ne.s32.totalorder %s41_s11, %s504_s20  ;;  %p510_p7 = scmp.lt.s32.totalorder %s504_s20, %s504_s20 }
  0x2d   :  { %p511_p8 = por %p510_p7, %p509_p6 }
  0x2f   :  { %p512_p9 = pnand %p511_p8, %p505_p5 }
  0x31   :  { %515 = shalt.err (!%p512_p9)
}
  0x32   :  { %46 = dma.hbm_to_vmem [thread:$0]  %s639_s2, 2048, %s41_s11, [#allocation6], %s546_s24, %s546_s24, %s547_s25  }
  0x33   :  { %538 = dma.done.wait [#allocation3], 256  }
  0x34   :  { %539 = vsyncadd [#allocation3], 4294967040 }
  0x35   :  { %540 = dma.done.wait [#allocation6], 4096  }
  0x36   :  { %541 = vsyncadd [#allocation6], 4294963200  ;;  %v58_v0 = vld [vmem:[#allocation5] sm:$0xff]  ;;  %v59_v1 = vld [vmem:[#allocation5 + $0x8] sm:$0xff]  ;;  %s549_s2 = smov [#allocation8]  }
  0x37   :  { %v60_v2 = vld [vmem:[#allocation5 + $0x10] sm:$0xff]  ;;  %v376_v3 = vpack.c.bf16 %v59_v1, %v58_v0  ;;  %v61_v4 = vld [vmem:[#allocation5 + $0x18] sm:$0xff]  ;;  %v62_v6 = vld [vmem:[#allocation5 + $0x20] sm:$0xff]  ;;  %s257_s21 = sshll.u32 %s549_s2, 4  ;;  %s258_s21 = int_to_ptr.vmem [resolvable:$true] %s257_s21 }
  0x38   :  { %v380_v5 = vpack.c.bf16 %v61_v4, %v60_v2  ;;  %v63_v7 = vld [vmem:[#allocation5 + $0x28] sm:$0xff]  ;;  %v64_v9 = vld [vmem:[#allocation5 + $0x30] sm:$0xff]  ;;  %v65_v10 = vld [vmem:[#allocation5 + $0x38] sm:$0xff]  ;;  %s516_s22 = scalar_lea.vmem %s258_s21, 256  ;;  %p521_p11 = scmp.lt.s32.totalorder %s258_s21, %s258_s21 }
  0x39   :  { %377 = vmatprep.subr.bf16.mxu0 %v376_v3  ;;  %v384_v8 = vpack.c.bf16 %v63_v7, %v62_v6  ;;  %v56_v11 = vld [vmem:[#allocation2] sm:$0xff]  ;;  %v159_v12 = vld [vmem:[#allocation7] sm:$0xff]  ;;  %v160_v13 = vld [vmem:[#allocation7 + $0x8] sm:$0xff]  ;;  %v388_v20 = vpack.c.bf16 %v65_v10, %v64_v9  ;;  %p517_p10 = scmp.ne.s32.totalorder %s258_s21, %s516_s22  ;;  %p522_p12 = scmp.lt.s32.totalorder %s516_s22, %s516_s22 }
  0x3a   :  { %379 = vmatpush3.bf16.msra.mxu0 %v376_v3  ;;  %338 = vmatprep.mubr.f32.mxu0 %v56_v11  ;;  %v161_v14 = vld [vmem:[#allocation7 + $0x10] sm:$0xff]  ;;  %v408_v15 = vpack.c.bf16 %v160_v13, %v159_v12  ;;  %v162_v16 = vld [vmem:[#allocation7 + $0x18] sm:$0xff]  ;;  %v163_v18 = vld [vmem:[#allocation7 + $0x20] sm:$0xff] }
  0x3b   :  { %381 = vmatprep.subr.bf16.mxu0 %v380_v5  ;;  %v412_v17 = vpack.c.bf16 %v162_v16, %v161_v14  ;;  %v164_v19 = vld [vmem:[#allocation7 + $0x28] sm:$0xff]  ;;  %v66_v21 = vld [vmem:[#allocation5 + $0x40] sm:$0xff]  ;;  %v68_v25 = vld [vmem:[#allocation5 + $0x50] sm:$0xff]  ;;  %p523_p13 = por %p522_p12, %p521_p11 }
  0x3c   :  { %409 = vmatprep.subr.bf16.mxu1 %v408_v15  ;;  %v67_v22 = vld [vmem:[#allocation5 + $0x48] sm:$0xff]  ;;  %v416_v23 = vpack.c.bf16 %v164_v19, %v163_v18  ;;  %v69_v26 = vld [vmem:[#allocation5 + $0x58] sm:$0xff]  ;;  %v70_v28 = vld [vmem:[#allocation5 + $0x60] sm:$0xff] }
  0x3d   :  { %411 = vmatpush3.bf16.msra.mxu1 %v408_v15  ;;  %v392_v24 = vpack.c.bf16 %v67_v22, %v66_v21  ;;  %v396_v27 = vpack.c.bf16 %v69_v26, %v68_v25  ;;  %v71_v29 = vld [vmem:[#allocation5 + $0x68] sm:$0xff]  ;;  %v72_v31 = vld [vmem:[#allocation5 + $0x70] sm:$0xff]  ;;  %v73_v32 = vld [vmem:[#allocation5 + $0x78] sm:$0xff]  ;;  %p524_p0 = pnand %p523_p13, %p517_p10 }
  0x3e   :  { %383 = vmatpush3.bf16.msra.mxu0 %v380_v5  ;;  %413 = vmatprep.subr.bf16.mxu1 %v412_v17  ;;  %v400_v30 = vpack.c.bf16 %v71_v29, %v70_v28  ;;  %v404_v33 = vpack.c.bf16 %v73_v32, %v72_v31  ;;  %v57_v34 = vld [vmem:[#allocation2 + $0x8] sm:$0xff]  ;;  %v165_v35 = vld [vmem:[#allocation7 + $0x30] sm:$0xff]  ;;  %v167_v38 = vld [vmem:[#allocation7 + $0x40] sm:$0xff] }
  0x3f   :  { %385 = vmatprep.subr.bf16.mxu0 %v384_v8  ;;  %v166_v36 = vld [vmem:[#allocation7 + $0x38] sm:$0xff]  ;;  %v168_v39 = vld [vmem:[#allocation7 + $0x48] sm:$0xff]  ;;  %v169_v41 = vld [vmem:[#allocation7 + $0x50] sm:$0xff] }
  0x40   :  { %v420_v37 = vpack.c.bf16 %v166_v36, %v165_v35  ;;  %v424_v40 = vpack.c.bf16 %v168_v39, %v167_v38  ;;  %v170_v42 = vld [vmem:[#allocation7 + $0x58] sm:$0xff]  ;;  %v171_v44 = vld [vmem:[#allocation7 + $0x60] sm:$0xff]  ;;  %v172_v45 = vld [vmem:[#allocation7 + $0x68] sm:$0xff] }
  0x41   :  { %415 = vmatpush3.bf16.msra.mxu1 %v412_v17  ;;  %v428_v43 = vpack.c.bf16 %v170_v42, %v169_v41  ;;  %v432_v46 = vpack.c.bf16 %v172_v45, %v171_v44  ;;  %v173_v47 = vld [vmem:[#allocation7 + $0x70] sm:$0xff]  ;;  %v174_v48 = vld [vmem:[#allocation7 + $0x78] sm:$0xff] }
  0x42   :  { %387 = vmatpush3.bf16.msra.mxu0 %v384_v8  ;;  %417 = vmatprep.subr.bf16.mxu1 %v416_v23  ;;  %v436_v49 = vpack.c.bf16 %v174_v48, %v173_v47 }
  0x43   :  { %389 = vmatprep.subr.bf16.mxu0 %v388_v20 }
  0x45   :  { %419 = vmatpush3.bf16.msra.mxu1 %v416_v23 }
  0x46   :  { %391 = vmatpush3.bf16.msra.mxu0 %v388_v20  ;;  %421 = vmatprep.subr.bf16.mxu1 %v420_v37 }
  0x47   :  { %393 = vmatprep.subr.bf16.mxu0 %v392_v24 }
  0x49   :  { %423 = vmatpush3.bf16.msra.mxu1 %v420_v37 }
  0x4a   :  { %395 = vmatpush3.bf16.msra.mxu0 %v392_v24  ;;  %425 = vmatprep.subr.bf16.mxu1 %v424_v40 }
  0x4b   :  { %397 = vmatprep.subr.bf16.mxu0 %v396_v27 }
  0x4d   :  { %427 = vmatpush3.bf16.msra.mxu1 %v424_v40 }
  0x4e   :  { %399 = vmatpush3.bf16.msra.mxu0 %v396_v27  ;;  %429 = vmatprep.subr.bf16.mxu1 %v428_v43 }
  0x4f   :  { %401 = vmatprep.subr.bf16.mxu0 %v400_v30 }
  0x51   :  { %431 = vmatpush3.bf16.msra.mxu1 %v428_v43 }
  0x52   :  { %403 = vmatpush3.bf16.msra.mxu0 %v400_v30  ;;  %433 = vmatprep.subr.bf16.mxu1 %v432_v46 }
  0x53   :  { %405 = vmatprep.subr.bf16.mxu0 %v404_v33 }
  0x55   :  { %435 = vmatpush3.bf16.msra.mxu1 %v432_v46 }
  0x56   :  { %407 = vmatpush3.bf16.msra.mxu0 %v404_v33  ;;  %437 = vmatprep.subr.bf16.mxu1 %v436_v49 }
  0x59   :  { %339 = vmatmul.mubr.f32.vlgmr.msra.gmra.mrb[0].mxu0 %v57_v34  ;;  %439 = vmatpush3.bf16.msra.mxu1 %v436_v49 }
 0x12c   :  { %v340_v50 = vpop.f32.mrb[0].mxu0 }
 0x12d   :  { %v152_v51 = vmul.f32 0.70710677, %v340_v50  ;;  %v140_v52 = vpop.f32.mrb[1].mxu0  ;;  %v150_v59 = vmul.f32 0.5, %v340_v50 }
 0x12e   :  { %v151_v53 = vmul.f32 0.70710677, %v140_v52  ;;  %v149_v57 = vmul.f32 0.5, %v140_v52 }
 0x12f   :  { %446 = verf.f32 %v152_v51 }
 0x130   :  { %448 = verf.f32 %v151_v53 }
 0x139   :  { %v447_v54 = vpop.eup %446 }
 0x13a   :  { %v449_v55 = vpop.eup %448  ;;  %v156_v56 = vadd.f32 1.0, %v447_v54 }
 0x13b   :  { %v155_v58 = vadd.f32 1.0, %v449_v55 }
 0x13c   :  { %v158_v61 = vmul.f32 %v156_v56, %v150_v59 }
 0x13d   :  { %v157_v60 = vmul.f32 %v155_v58, %v149_v57 }
 0x13f   :  { %373 = vmatprep.mubr.f32.mxu1 %v157_v60 }
 0x140   :  { %374 = vmatmul.mubr.f32.vlgmr.msra.gmra.mrb[0].mxu1 %v158_v61 }
 0x213   :  { %v375_v62 = vpop.f32.mrb[0].mxu1 }
 0x214   :  { %251 = vst [vmem:[#allocation8 + $0x8] sm:$0xff] %v375_v62  ;;  %v241_v63 = vpop.f32.mrb[1].mxu1 }
 0x215   :  { %250 = vst [vmem:[#allocation8] sm:$0xff] %v241_v63 }
 0x216   :  { %527 = shalt.err (!%p524_p0)
}
 0x217   :  { %s528_s27 = scalar_lea.hbm %s640_s3, 256 }
 0x218   :  { %p529_p1 = scmp.ne.s32.totalorder %s640_s3, %s528_s27  ;;  %p532_p2 = scmp.lt.u32.totalorder %s528_s27, %s640_s3 }
 0x21a   :  { %p534_p3 = pnand %p532_p2, %p529_p1 }
 0x21c   :  { %537 = shalt.err (!%p534_p3)
}
 0x21d   :  { %263 = dma.vmem_to_hbm [thread:$0]  %s258_s21, 256, %s640_s3, [#allocation4], %s546_s24, %s546_s24, %s547_s25  }
 0x21e   :  { %542 = dma.done.wait [#allocation4], 256  }
 0x21f   :  { %543 = vsyncadd [#allocation4], 4294967040 }
 0x220   :  { %267 = vsyncpa [#allocation3], 1 }
 0x221   :  { %268 = vsyncpa [#allocation6], 1 }
 0x222   :  { %269 = vsyncpa [#allocation4], 1 }

// kernel: tpu_custom_call.1
= control target key start
LH: loop header
LB: loop body
LE: loop exit
PB: predicated region body
PF: predicated region fallthrough
CT: control target
= control target key end

     0   :  { %8 = vsyncpa [#allocation3], 0  ;;  %s637_s0 = inlined_call_operand.hbm [shape: f32[16,128], index: 0, kind: input, shape index: {}]   ;;  %s638_s1 = inlined_call_operand.hbm [shape: f32[128,128], index: 1, kind: input, shape index: {}]   ;;  %s639_s2 = inlined_call_operand.hbm [shape: f32[128,128], index: 2, kind: input, shape index: {}]   ;;  %s640_s3 = inlined_call_operand.hbm [shape: f32[16,128], index: 3, kind: output, shape index: {}]  }
   0x1   :  { %9 = vsyncpa [#allocation6], 0 }
   0x2   :  { %10 = vsyncpa [#allocation4], 0  ;;  %s544_s12 = smov [#allocation5]   ;;  %s545_s14 = smov [#allocation2]  }
   0x3   :  { %s28_s13 = sshll.u32 %s544_s12, 4  ;;  %s16_s15 = sshll.u32 %s545_s14, 4  ;;  %s29_s13 = int_to_ptr.vmem [resolvable:$true] %s28_s13  ;;  %s570_s15 = int_to_ptr.vmem [resolvable:$true] %s16_s15 }
   0x4   :  { %s450_s18 = scalar_lea.hbm %s638_s1, 2048 }
   0x5   :  { %p451_p0 = scmp.ne.s32.totalorder %s638_s1, %s450_s18  ;;  %p454_p1 = scmp.lt.u32.totalorder %s450_s18, %s638_s1 }
   0x7   :  { %p456_p2 = pnand %p454_p1, %p451_p0 }
   0x9   :  { %459 = shalt.err (!%p456_p2)
}
   0xa   :  { %s460_s23 = scalar_lea.vmem %s29_s13, 2048  ;;  %p465_p4 = scmp.lt.s32.totalorder %s29_s13, %s29_s13 }
   0xb   :  { %p461_p3 = scmp.ne.s32.totalorder %s29_s13, %s460_s23  ;;  %p466_p5 = scmp.lt.s32.totalorder %s460_s23, %s460_s23 }
   0xd   :  { %p467_p6 = por %p466_p5, %p465_p4 }
   0xf   :  { %p468_p7 = pnand %p467_p6, %p461_p3 }
  0x11   :  { %471 = shalt.err (!%p468_p7)
}
  0x12   :  { %s546_s24 = smov 128   ;;  %s547_s25 = smov 8  }
  0x13   :  { %34 = dma.hbm_to_vmem [thread:$0]  %s638_s1, 2048, %s29_s13, [#allocation6], %s546_s24, %s546_s24, %s547_s25  }
  0x14   :  { %s472_s30 = scalar_lea.hbm %s637_s0, 256 }
  0x15   :  { %p473_p8 = scmp.ne.s32.totalorder %s637_s0, %s472_s30  ;;  %p476_p9 = scmp.lt.u32.totalorder %s472_s30, %s637_s0 }
  0x17   :  { %p478_p10 = pnand %p476_p9, %p473_p8 }
  0x19   :  { %481 = shalt.err (!%p478_p10)
}
  0x1a   :  { %s482_s8 = scalar_lea.vmem %s570_s15, 256  ;;  %p487_p12 = scmp.lt.s32.totalorder %s570_s15, %s570_s15 }
  0x1b   :  { %p483_p11 = scmp.ne.s32.totalorder %s570_s15, %s482_s8  ;;  %p488_p13 = scmp.lt.s32.totalorder %s482_s8, %s482_s8 }
  0x1d   :  { %p489_p0 = por %p488_p13, %p487_p12 }
  0x1f   :  { %p490_p1 = pnand %p489_p0, %p483_p11 }
  0x21   :  { %493 = shalt.err (!%p490_p1)
}
  0x22   :  { %22 = dma.hbm_to_vmem [thread:$0]  %s637_s0, 256, %s570_s15, [#allocation3], %s546_s24, %s546_s24, %s547_s25  }
  0x23   :  { %s548_s10 = smov [#allocation7]   ;;  %s494_s14 = scalar_lea.hbm %s639_s2, 2048 }
  0x24   :  { %s40_s11 = sshll.u32 %s548_s10, 4  ;;  %p495_p2 = scmp.ne.s32.totalorder %s639_s2, %s494_s14  ;;  %s41_s11 = int_to_ptr.vmem [resolvable:$true] %s40_s11 }
  0x25   :  { %p498_p3 = scmp.lt.u32.totalorder %s494_s14, %s639_s2 }
  0x27   :  { %p500_p4 = pnand %p498_p3, %p495_p2 }
  0x29   :  { %503 = shalt.err (!%p500_p4)
}
  0x2a   :  { %s504_s20 = scalar_lea.vmem %s41_s11, 2048  ;;  %p509_p6 = scmp.lt.s32.totalorder %s41_s11, %s41_s11 }
  0x2b   :  { %p505_p5 = scmp.ne.s32.totalorder %s41_s11, %s504_s20  ;;  %p510_p7 = scmp.lt.s32.totalorder %s504_s20, %s504_s20 }
  0x2d   :  { %p511_p8 = por %p510_p7, %p509_p6 }
  0x2f   :  { %p512_p9 = pnand %p511_p8, %p505_p5 }
  0x31   :  { %515 = shalt.err (!%p512_p9)
}
  0x32   :  { %46 = dma.hbm_to_vmem [thread:$0]  %s639_s2, 2048, %s41_s11, [#allocation6], %s546_s24, %s546_s24, %s547_s25  }
  0x33   :  { %538 = dma.done.wait [#allocation3], 256  }
  0x34   :  { %539 = vsyncadd [#allocation3], 4294967040 }
  0x35   :  { %540 = dma.done.wait [#allocation6], 4096  }
  0x36   :  { %541 = vsyncadd [#allocation6], 4294963200  ;;  %v58_v0 = vld [vmem:[#allocation5] sm:$0xff]  ;;  %v59_v1 = vld [vmem:[#allocation5 + $0x8] sm:$0xff]  ;;  %s549_s2 = smov [#allocation8]  }
  0x37   :  { %v60_v2 = vld [vmem:[#allocation5 + $0x10] sm:$0xff]  ;;  %v376_v3 = vpack.c.bf16 %v59_v1, %v58_v0  ;;  %v61_v4 = vld [vmem:[#allocation5 + $0x18] sm:$0xff]  ;;  %v62_v6 = vld [vmem:[#allocation5 + $0x20] sm:$0xff]  ;;  %s257_s21 = sshll.u32 %s549_s2, 4  ;;  %s258_s21 = int_to_ptr.vmem [resolvable:$true] %s257_s21 }
  0x38   :  { %v380_v5 = vpack.c.bf16 %v61_v4, %v60_v2  ;;  %v63_v7 = vld [vmem:[#allocation5 + $0x28] sm:$0xff]  ;;  %v64_v9 = vld [vmem:[#allocation5 + $0x30] sm:$0xff]  ;;  %v65_v10 = vld [vmem:[#allocation5 + $0x38] sm:$0xff]  ;;  %s516_s22 = scalar_lea.vmem %s258_s21, 256  ;;  %p521_p11 = scmp.lt.s32.totalorder %s258_s21, %s258_s21 }
  0x39   :  { %377 = vmatprep.subr.bf16.mxu0 %v376_v3  ;;  %v384_v8 = vpack.c.bf16 %v63_v7, %v62_v6  ;;  %v56_v11 = vld [vmem:[#allocation2] sm:$0xff]  ;;  %v159_v12 = vld [vmem:[#allocation7] sm:$0xff]  ;;  %v160_v13 = vld [vmem:[#allocation7 + $0x8] sm:$0xff]  ;;  %v388_v20 = vpack.c.bf16 %v65_v10, %v64_v9  ;;  %p517_p10 = scmp.ne.s32.totalorder %s258_s21, %s516_s22  ;;  %p522_p12 = scmp.lt.s32.totalorder %s516_s22, %s516_s22 }
  0x3a   :  { %379 = vmatpush3.bf16.msra.mxu0 %v376_v3  ;;  %338 = vmatprep.mubr.f32.mxu0 %v56_v11  ;;  %v161_v14 = vld [vmem:[#allocation7 + $0x10] sm:$0xff]  ;;  %v408_v15 = vpack.c.bf16 %v160_v13, %v159_v12  ;;  %v162_v16 = vld [vmem:[#allocation7 + $0x18] sm:$0xff]  ;;  %v163_v18 = vld [vmem:[#allocation7 + $0x20] sm:$0xff] }
  0x3b   :  { %381 = vmatprep.subr.bf16.mxu0 %v380_v5  ;;  %v412_v17 = vpack.c.bf16 %v162_v16, %v161_v14  ;;  %v164_v19 = vld [vmem:[#allocation7 + $0x28] sm:$0xff]  ;;  %v66_v21 = vld [vmem:[#allocation5 + $0x40] sm:$0xff]  ;;  %v68_v25 = vld [vmem:[#allocation5 + $0x50] sm:$0xff]  ;;  %p523_p13 = por %p522_p12, %p521_p11 }
  0x3c   :  { %409 = vmatprep.subr.bf16.mxu1 %v408_v15  ;;  %v67_v22 = vld [vmem:[#allocation5 + $0x48] sm:$0xff]  ;;  %v416_v23 = vpack.c.bf16 %v164_v19, %v163_v18  ;;  %v69_v26 = vld [vmem:[#allocation5 + $0x58] sm:$0xff]  ;;  %v70_v28 = vld [vmem:[#allocation5 + $0x60] sm:$0xff] }
  0x3d   :  { %411 = vmatpush3.bf16.msra.mxu1 %v408_v15  ;;  %v392_v24 = vpack.c.bf16 %v67_v22, %v66_v21  ;;  %v396_v27 = vpack.c.bf16 %v69_v26, %v68_v25  ;;  %v71_v29 = vld [vmem:[#allocation5 + $0x68] sm:$0xff]  ;;  %v72_v31 = vld [vmem:[#allocation5 + $0x70] sm:$0xff]  ;;  %v73_v32 = vld [vmem:[#allocation5 + $0x78] sm:$0xff]  ;;  %p524_p0 = pnand %p523_p13, %p517_p10 }
  0x3e   :  { %383 = vmatpush3.bf16.msra.mxu0 %v380_v5  ;;  %413 = vmatprep.subr.bf16.mxu1 %v412_v17  ;;  %v400_v30 = vpack.c.bf16 %v71_v29, %v70_v28  ;;  %v404_v33 = vpack.c.bf16 %v73_v32, %v72_v31  ;;  %v57_v34 = vld [vmem:[#allocation2 + $0x8] sm:$0xff]  ;;  %v165_v35 = vld [vmem:[#allocation7 + $0x30] sm:$0xff]  ;;  %v167_v38 = vld [vmem:[#allocation7 + $0x40] sm:$0xff] }
  0x3f   :  { %385 = vmatprep.subr.bf16.mxu0 %v384_v8  ;;  %v166_v36 = vld [vmem:[#allocation7 + $0x38] sm:$0xff]  ;;  %v168_v39 = vld [vmem:[#allocation7 + $0x48] sm:$0xff]  ;;  %v169_v41 = vld [vmem:[#allocation7 + $0x50] sm:$0xff] }
  0x40   :  { %v420_v37 = vpack.c.bf16 %v166_v36, %v165_v35  ;;  %v424_v40 = vpack.c.bf16 %v168_v39, %v167_v38  ;;  %v170_v42 = vld [vmem:[#allocation7 + $0x58] sm:$0xff]  ;;  %v171_v44 = vld [vmem:[#allocation7 + $0x60] sm:$0xff]  ;;  %v172_v45 = vld [vmem:[#allocation7 + $0x68] sm:$0xff] }
  0x41   :  { %415 = vmatpush3.bf16.msra.mxu1 %v412_v17  ;;  %v428_v43 = vpack.c.bf16 %v170_v42, %v169_v41  ;;  %v432_v46 = vpack.c.bf16 %v172_v45, %v171_v44  ;;  %v173_v47 = vld [vmem:[#allocation7 + $0x70] sm:$0xff]  ;;  %v174_v48 = vld [vmem:[#allocation7 + $0x78] sm:$0xff] }
  0x42   :  { %387 = vmatpush3.bf16.msra.mxu0 %v384_v8  ;;  %417 = vmatprep.subr.bf16.mxu1 %v416_v23  ;;  %v436_v49 = vpack.c.bf16 %v174_v48, %v173_v47 }
  0x43   :  { %389 = vmatprep.subr.bf16.mxu0 %v388_v20 }
  0x45   :  { %419 = vmatpush3.bf16.msra.mxu1 %v416_v23 }
  0x46   :  { %391 = vmatpush3.bf16.msra.mxu0 %v388_v20  ;;  %421 = vmatprep.subr.bf16.mxu1 %v420_v37 }
  0x47   :  { %393 = vmatprep.subr.bf16.mxu0 %v392_v24 }
  0x49   :  { %423 = vmatpush3.bf16.msra.mxu1 %v420_v37 }
  0x4a   :  { %395 = vmatpush3.bf16.msra.mxu0 %v392_v24  ;;  %425 = vmatprep.subr.bf16.mxu1 %v424_v40 }
  0x4b   :  { %397 = vmatprep.subr.bf16.mxu0 %v396_v27 }
  0x4d   :  { %427 = vmatpush3.bf16.msra.mxu1 %v424_v40 }
  0x4e   :  { %399 = vmatpush3.bf16.msra.mxu0 %v396_v27  ;;  %429 = vmatprep.subr.bf16.mxu1 %v428_v43 }
  0x4f   :  { %401 = vmatprep.subr.bf16.mxu0 %v400_v30 }
  0x51   :  { %431 = vmatpush3.bf16.msra.mxu1 %v428_v43 }
  0x52   :  { %403 = vmatpush3.bf16.msra.mxu0 %v400_v30  ;;  %433 = vmatprep.subr.bf16.mxu1 %v432_v46 }
  0x53   :  { %405 = vmatprep.subr.bf16.mxu0 %v404_v33 }
  0x55   :  { %435 = vmatpush3.bf16.msra.mxu1 %v432_v46 }
  0x56   :  { %407 = vmatpush3.bf16.msra.mxu0 %v404_v33  ;;  %437 = vmatprep.subr.bf16.mxu1 %v436_v49 }
  0x59   :  { %339 = vmatmul.mubr.f32.vlgmr.msra.gmra.mrb[0].mxu0 %v57_v34  ;;  %439 = vmatpush3.bf16.msra.mxu1 %v436_v49 }
 0x12c   :  { %v340_v50 = vpop.f32.mrb[0].mxu0 }
 0x12d   :  { %v152_v51 = vmul.f32 0.70710677, %v340_v50  ;;  %v140_v52 = vpop.f32.mrb[1].mxu0  ;;  %v150_v59 = vmul.f32 0.5, %v340_v50 }
 0x12e   :  { %v151_v53 = vmul.f32 0.70710677, %v140_v52  ;;  %v149_v57 = vmul.f32 0.5, %v140_v52 }
 0x12f   :  { %446 = verf.f32 %v152_v51 }
 0x130   :  { %448 = verf.f32 %v151_v53 }
 0x139   :  { %v447_v54 = vpop.eup %446 }
 0x13a   :  { %v449_v55 = vpop.eup %448  ;;  %v156_v56 = vadd.f32 1.0, %v447_v54 }
 0x13b   :  { %v155_v58 = vadd.f32 1.0, %v449_v55 }
 0x13c   :  { %v158_v61 = vmul.f32 %v156_v56, %v150_v59 }
 0x13d   :  { %v157_v60 = vmul.f32 %v155_v58, %v149_v57 }
 0x13f   :  { %373 = vmatprep.mubr.f32.mxu1 %v157_v60 }
 0x140   :  { %374 = vmatmul.mubr.f32.vlgmr.msra.gmra.mrb[0].mxu1 %v158_v61 }
 0x213   :  { %v375_v62 = vpop.f32.mrb[0].mxu1 }
 0x214   :  { %251 = vst [vmem:[#allocation8 + $0x8] sm:$0xff] %v375_v62  ;;  %v241_v63 = vpop.f32.mrb[1].mxu1 }
 0x215   :  { %250 = vst [vmem:[#allocation8] sm:$0xff] %v241_v63 }
 0x216   :  { %527 = shalt.err (!%p524_p0)
}
 0x217   :  { %s528_s27 = scalar_lea.hbm %s640_s3, 256 }
 0x218   :  { %p529_p1 = scmp.ne.s32.totalorder %s640_s3, %s528_s27  ;;  %p532_p2 = scmp.lt.u32.totalorder %s528_s27, %s640_s3 }
 0x21a   :  { %p534_p3 = pnand %p532_p2, %p529_p1 }
 0x21c   :  { %537 = shalt.err (!%p534_p3)
}
 0x21d   :  { %263 = dma.vmem_to_hbm [thread:$0]  %s258_s21, 256, %s640_s3, [#allocation4], %s546_s24, %s546_s24, %s547_s25  }
 0x21e   :  { %542 = dma.done.wait [#allocation4], 256  }
 0x21f   :  { %543 = vsyncadd [#allocation4], 4294967040 }
 0x220   :  { %267 = vsyncpa [#allocation3], 1 }
 0x221   :  { %268 = vsyncpa [#allocation6], 1 }
 0x222   :  { %269 = vsyncpa [#allocation4], 1 }

</bundles_post_ra>
